<compile_context>
chip_gen: v7x
topology: tpu7x:2x2x1
jax: 0.10.0
libtpu: 0.0.40
codegen_flags: <defaults>
</compile_context>

<pallas_src>
import functools

import jax
import jax.numpy as jnp
from jax.experimental import pallas as pl
from jax.experimental.pallas import tpu as pltpu

FEATURES = ['gasLimit', 'gasPrice', 'gasUsed', 'nonce', 'receiver',
            'sender', 'value', 'fee', 'timestamp']
INPUT_DIM = len(FEATURES)   # 9
HIDDEN_DIM = 32


def _round_up(x, m):
    return (x + m - 1) // m * m


# --------------------------------------------------------------------------
# Kernel: one SAGEConv layer, grid = (row_tiles, k_tiles).
#   a_ref   : (TM, TK)  bf16  adjacency counts tile (exact small ints)
#   xn_ref  : (TK, Fin) f32   neighbour features (K-indexed)
#   xs_ref  : (TM, Fin) f32   self features (row-indexed)
#   inv_ref : (TM, 1)   f32   1 / max(in_degree, 1)
#   wb_ref  : packed [W_l | W_r | b] slab (rows 8-aligned per section)
#   o_ref   : (TM, H)   f32   layer output
#   acc_ref : (TM, Fin) f32   VMEM scratch accumulator for A @ x
# --------------------------------------------------------------------------
def _sage_layer_kernel(a_ref, xn_ref, xs_ref, inv_ref, wb_ref, o_ref, acc_ref,
                       *, k_in, k_stride, activation):
    k = pl.program_id(1)

    @pl.when(k == 0)
    def _():
        acc_ref[...] = jnp.zeros_like(acc_ref)

    # Aggregation numerator on the MXU; bf16->f32 cast of the 0/1 counts is
    # exact, accumulation is explicit f32.
    a = a_ref[...].astype(jnp.float32)
    acc_ref[...] += jnp.dot(a, xn_ref[...], preferred_element_type=jnp.float32)

    @pl.when(k == pl.num_programs(1) - 1)
    def _():
        wb = wb_ref[...]
        w_l = wb[0:k_in, :]
        w_r = wb[k_stride:k_stride + k_in, :]
        b = wb[2 * k_stride:2 * k_stride + 1, :]

        # Fold mean normalization here (VPU multiply, exact f32 reciprocal
        # computed once in the wrapper as an O(N) op).
        agg = acc_ref[...] * inv_ref[...]

        h = (jnp.dot(agg, w_l, preferred_element_type=jnp.float32)
             + jnp.dot(xs_ref[...], w_r, preferred_element_type=jnp.float32)
             + b)
        if activation == "relu":
            h = jnp.maximum(h, 0.0)
        else:  # "sigmoid"
            h = jax.nn.sigmoid(h)
        o_ref[...] = h


def _sage_layer(adj_bf16, feats, inv_deg, wb, *, k_in, h_out, activation,
                tm, tk):
    n_pad = adj_bf16.shape[0]
    k_stride = _round_up(k_in, 8)
    kernel = functools.partial(_sage_layer_kernel, k_in=k_in,
                               k_stride=k_stride, activation=activation)
    grid = (n_pad // tm, n_pad // tk)
    return pl.pallas_call(
        kernel,
        out_shape=jax.ShapeDtypeStruct((n_pad, h_out), jnp.float32),
        grid_spec=pltpu.PrefetchScalarGridSpec(
            num_scalar_prefetch=0,
            grid=grid,
            in_specs=[
                pl.BlockSpec((tm, tk), lambda i, k: (i, k)),     # adjacency
                pl.BlockSpec((tk, k_in), lambda i, k: (k, 0)),   # neighbour x
                pl.BlockSpec((tm, k_in), lambda i, k: (i, 0)),   # self x
                pl.BlockSpec((tm, 1), lambda i, k: (i, 0)),      # 1/deg
                pl.BlockSpec(wb.shape, lambda i, k: (0, 0)),     # packed params
            ],
            out_specs=pl.BlockSpec((tm, h_out), lambda i, k: (i, 0)),
            scratch_shapes=[pltpu.VMEM((tm, k_in), jnp.float32)],
        ),
        compiler_params=pltpu.CompilerParams(
            dimension_semantics=("parallel", "arbitrary"),
            vmem_limit_bytes=64 * 1024 * 1024,
        ),
    )(adj_bf16, feats, feats, inv_deg, wb)


# --------------------------------------------------------------------------
# Parameters
# --------------------------------------------------------------------------
def _pack_layer(w_l, w_r, b):
    """Pack [W_l | W_r | bias] into one 8-row-aligned f32 slab (one DMA)."""
    k_in, h = w_l.shape
    stride = _round_up(k_in, 8)
    slab = jnp.zeros((2 * stride + 8, h), jnp.float32)
    slab = slab.at[0:k_in, :].set(w_l)
    slab = slab.at[stride:stride + k_in, :].set(w_r)
    slab = slab.at[2 * stride, :].set(b.reshape(h))
    return slab


def init_params(key, input_dim=INPUT_DIM, hidden_dim=HIDDEN_DIM):
    ks = jax.random.split(key, 6)
    s1 = 1.0 / jnp.sqrt(input_dim)
    s2 = 1.0 / jnp.sqrt(hidden_dim)
    w1l = jax.random.uniform(ks[0], (input_dim, hidden_dim), jnp.float32, -s1, s1)
    b1 = jax.random.uniform(ks[1], (1, hidden_dim), jnp.float32, -s1, s1)
    w1r = jax.random.uniform(ks[2], (input_dim, hidden_dim), jnp.float32, -s1, s1)
    w2l = jax.random.uniform(ks[3], (hidden_dim, 1), jnp.float32, -s2, s2)
    b2 = jax.random.uniform(ks[4], (1, 1), jnp.float32, -s2, s2)
    w2r = jax.random.uniform(ks[5], (hidden_dim, 1), jnp.float32, -s2, s2)
    return {
        "w1l": w1l, "b1": b1, "w1r": w1r,
        "w2l": w2l, "b2": b2, "w2r": w2r,
        "wb1": _pack_layer(w1l, w1r, b1),
        "wb2": _pack_layer(w2l, w2r, b2),
    }


# --------------------------------------------------------------------------
# Forward
# --------------------------------------------------------------------------
def gnn_forward(x, edge_index, params, *, tm=256, tk=512):
    """x: (N, input_dim) float32; edge_index: (2, E) int32 (src, dst)."""
    n, f_in = x.shape
    h_dim = params["wb1"].shape[1]
    out_dim = params["wb2"].shape[1]

    # Tile / padding selection (single tile for small graphs, (tm, tk) grid
    # otherwise; padded rows/cols are zero and never influence real rows).
    if n <= tk:
        n_pad = _round_up(n, 16)
        tm_eff = tk_eff = n_pad
    else:
        assert tk % tm == 0 and tk % 128 == 0 and tm % 16 == 0
        n_pad = _round_up(n, tk)
        tm_eff, tk_eff = tm, tk

    src = edge_index[0].astype(jnp.int32)
    dst = edge_index[1].astype(jnp.int32)

    # Raw (count) adjacency + exact reciprocal degree; the O(N^2) tensor is
    # stored in bf16 (counts are small integers -> exact), normalization is
    # applied inside the kernel.
    adj = jnp.zeros((n_pad, n_pad), jnp.float32).at[dst, src].add(1.0)
    deg = adj.sum(axis=1, keepdims=True)
    inv_deg = 1.0 / jnp.maximum(deg, 1.0)
    adj = adj.astype(jnp.bfloat16)

    x_pad = jnp.zeros((n_pad, f_in), jnp.float32).at[:n].set(
        x.astype(jnp.float32))

    h1 = _sage_layer(adj, x_pad, inv_deg, params["wb1"],
                     k_in=f_in, h_out=h_dim, activation="relu",
                     tm=tm_eff, tk=tk_eff)
    out = _sage_layer(adj, h1, inv_deg, params["wb2"],
                      k_in=h_dim, h_out=out_dim, activation="sigmoid",
                      tm=tm_eff, tk=tk_eff)
    return out[:n]


# --------------------------------------------------------------------------
# Pure-JAX reference (uses the unpacked weights)
# --------------------------------------------------------------------------
def _reference(x, edge_index, params):
    n = x.shape[0]
    src, dst = edge_index[0], edge_index[1]
    adj = jnp.zeros((n, n), jnp.float32).at[dst, src].add(1.0)
    deg = jnp.maximum(adj.sum(axis=1, keepdims=True), 1.0)
    adj = adj / deg
    h1 = jnp.maximum(adj @ x @ params["w1l"] + params["b1"]
                     + x @ params["w1r"], 0.0)
    h2 = adj @ h1 @ params["w2l"] + params["b2"] + h1 @ params["w2r"]
    return jax.nn.sigmoid(h2)


if __name__ == "__main__":
    key = jax.random.PRNGKey(0)
    k_x, k_p, k_g = jax.random.split(key, 3)

    params = init_params(k_p)

    # ---- Test 1: tiny deterministic graph (N=8) — single-tile path ----
    N = 8
    x = jax.random.normal(k_x, (N, INPUT_DIM), jnp.float32)
    src = jnp.array([0, 1, 2, 3, 4, 5, 6, 7, 0, 3], dtype=jnp.int32)
    dst = jnp.array([1, 2, 3, 4, 5, 6, 7, 0, 4, 7], dtype=jnp.int32)
    edge_index = jnp.stack([src, dst], axis=0)

    out = jax.block_until_ready(gnn_forward(x, edge_index, params))
    ref = _reference(x, edge_index, params)
    assert out.shape == (N, 1)
    assert jnp.allclose(out, ref, atol=1e-5, rtol=1e-5), float(
        jnp.max(jnp.abs(out - ref)))

    # ---- Test 2: larger random graph — exercises the tiled grid with the
    #      K accumulator and "parallel" row axis ----
    N2, E2 = 200, 600
    kx2, ke2, ke3 = jax.random.split(k_g, 3)
    x2 = jax.random.normal(kx2, (N2, INPUT_DIM), jnp.float32)
    src2 = jax.random.randint(ke2, (E2,), 0, N2, dtype=jnp.int32)
    dst2 = jax.random.randint(ke3, (E2,), 0, N2, dtype=jnp.int32)
    ei2 = jnp.stack([src2, dst2], axis=0)

    out2 = jax.block_until_ready(gnn_forward(x2, ei2, params, tm=64, tk=128))
    ref2 = _reference(x2, ei2, params)
    assert out2.shape == (N2, 1)
    assert jnp.allclose(out2, ref2, atol=1e-5, rtol=1e-5), float(
        jnp.max(jnp.abs(out2 - ref2)))

    print("KERNEL_OK")
</pallas_src>

<mosaic_0001>
module attributes {stable_mosaic.version = 11 : i64} {
  func.func @_sage_layer_kernel(%arg0: i32, %arg1: i32, %arg2: memref<16x16xbf16, #tpu.memory_space<vmem>>, %arg3: memref<16x9xf32, #tpu.memory_space<vmem>>, %arg4: memref<16x9xf32, #tpu.memory_space<vmem>>, %arg5: memref<16x1xf32, #tpu.memory_space<vmem>>, %arg6: memref<40x32xf32, #tpu.memory_space<vmem>>, %arg7: memref<16x32xf32, #tpu.memory_space<vmem>>, %arg8: memref<16x9xf32, #tpu.memory_space<vmem>>) attributes {dimension_semantics = [#tpu.dimension_semantics<parallel>, #tpu.dimension_semantics<arbitrary>], iteration_bounds = array<i64: 1, 1>, scalar_prefetch = 0 : i64, scratch_operands = 1 : i64, tpu.core_type = #tpu.core_type<tc>, window_params = [{transform_indices = @transform_0, window_bounds = array<i64: 16, 16>}, {transform_indices = @transform_1, window_bounds = array<i64: 16, 9>}, {transform_indices = @transform_2, window_bounds = array<i64: 16, 9>}, {transform_indices = @transform_3, window_bounds = array<i64: 16, 1>}, {pipeline_mode = #tpu.pipeline_mode<synchronous>, transform_indices = @transform_4, window_bounds = array<i64: 40, 32>}, {transform_indices = @transform_5, window_bounds = array<i64: 16, 32>}]} {
    %c0_i32 = arith.constant 0 : i32
    %0 = arith.cmpi eq, %arg1, %c0_i32 : i32
    %1 = arith.extui %0 : i1 to i32
    %c0_i32_0 = arith.constant 0 : i32
    %2 = arith.cmpi ne, %1, %c0_i32_0 : i32
    scf.if %2 {
      %cst_10 = arith.constant 0.000000e+00 : f32
      %13 = vector.broadcast %cst_10 : f32 to vector<16x9xf32>
      %c0_11 = arith.constant 0 : index
      %c0_12 = arith.constant 0 : index
      %14 = vector.load %arg8[%c0_11, %c0_12] : memref<16x9xf32, #tpu.memory_space<vmem>>, vector<16x9xf32>
      tpu.vector_store %arg8[%c0_11, %c0_12], %13 {strides = array<i32>} : memref<16x9xf32, #tpu.memory_space<vmem>>, vector<16x9xf32>,
    } else {
    }
    %c0 = arith.constant 0 : index
    %c0_1 = arith.constant 0 : index
    %3 = vector.load %arg2[%c0, %c0_1] : memref<16x16xbf16, #tpu.memory_space<vmem>>, vector<16x16xbf16>
    %4 = arith.extf %3 : vector<16x16xbf16> to vector<16x16xf32>
    %c0_2 = arith.constant 0 : index
    %c0_3 = arith.constant 0 : index
    %5 = vector.load %arg8[%c0_2, %c0_3] : memref<16x9xf32, #tpu.memory_space<vmem>>, vector<16x9xf32>
    %c0_4 = arith.constant 0 : index
    %c0_5 = arith.constant 0 : index
    %6 = vector.load %arg3[%c0_4, %c0_5] : memref<16x9xf32, #tpu.memory_space<vmem>>, vector<16x9xf32>
    %cst = arith.constant dense<0.000000e+00> : vector<16x9xf32>
    %7 = tpu.matmul %4, %6, %cst {dimension_numbers = #tpu.dot_dimension_numbers<[1], [0], [0], [1], [0, 0, 1, 1], [], []>} : vector<16x16xf32>, vector<16x9xf32>, vector<16x9xf32> -> vector<16x9xf32>
    %8 = arith.addf %5, %7 : vector<16x9xf32>
    %c0_6 = arith.constant 0 : index
    %c0_7 = arith.constant 0 : index
    %9 = vector.load %arg8[%c0_6, %c0_7] : memref<16x9xf32, #tpu.memory_space<vmem>>, vector<16x9xf32>
    tpu.vector_store %arg8[%c0_6, %c0_7], %8 {strides = array<i32>} : memref<16x9xf32, #tpu.memory_space<vmem>>, vector<16x9xf32>,
    %c0_i32_8 = arith.constant 0 : i32
    %10 = arith.cmpi eq, %arg1, %c0_i32_8 : i32
    %11 = arith.extui %10 : i1 to i32
    %c0_i32_9 = arith.constant 0 : i32
    %12 = arith.cmpi ne, %11, %c0_i32_9 : i32
    scf.if %12 {
      %c0_10 = arith.constant 0 : index
      %c0_11 = arith.constant 0 : index
      %13 = vector.load %arg6[%c0_10, %c0_11] : memref<40x32xf32, #tpu.memory_space<vmem>>, vector<40x32xf32>
      %14 = vector.extract_strided_slice %13 {offsets = [0, 0], sizes = [9, 32], strides = [1, 1]} : vector<40x32xf32> to vector<9x32xf32>
      %15 = vector.extract_strided_slice %13 {offsets = [16, 0], sizes = [9, 32], strides = [1, 1]} : vector<40x32xf32> to vector<9x32xf32>
      %16 = vector.extract_strided_slice %13 {offsets = [32, 0], sizes = [1, 32], strides = [1, 1]} : vector<40x32xf32> to vector<1x32xf32>
      %c0_12 = arith.constant 0 : index
      %c0_13 = arith.constant 0 : index
      %17 = vector.load %arg8[%c0_12, %c0_13] : memref<16x9xf32, #tpu.memory_space<vmem>>, vector<16x9xf32>
      %c0_14 = arith.constant 0 : index
      %c0_15 = arith.constant 0 : index
      %18 = vector.load %arg5[%c0_14, %c0_15] : memref<16x1xf32, #tpu.memory_space<vmem>>, vector<16x1xf32>
      %19 = vector.broadcast %18 : vector<16x1xf32> to vector<16x9xf32>
      %20 = arith.mulf %17, %19 : vector<16x9xf32>
      %cst_16 = arith.constant dense<0.000000e+00> : vector<16x32xf32>
      %21 = tpu.matmul %20, %14, %cst_16 {dimension_numbers = #tpu.dot_dimension_numbers<[1], [0], [0], [1], [0, 0, 1, 1], [], []>} : vector<16x9xf32>, vector<9x32xf32>, vector<16x32xf32> -> vector<16x32xf32>
      %c0_17 = arith.constant 0 : index
      %c0_18 = arith.constant 0 : index
      %22 = vector.load %arg4[%c0_17, %c0_18] : memref<16x9xf32, #tpu.memory_space<vmem>>, vector<16x9xf32>
      %cst_19 = arith.constant dense<0.000000e+00> : vector<16x32xf32>
      %23 = tpu.matmul %22, %15, %cst_19 {dimension_numbers = #tpu.dot_dimension_numbers<[1], [0], [0], [1], [0, 0, 1, 1], [], []>} : vector<16x9xf32>, vector<9x32xf32>, vector<16x32xf32> -> vector<16x32xf32>
      %24 = arith.addf %21, %23 : vector<16x32xf32>
      %25 = vector.broadcast %16 : vector<1x32xf32> to vector<16x32xf32>
      %26 = arith.addf %24, %25 : vector<16x32xf32>
      %cst_20 = arith.constant 0.000000e+00 : f32
      %27 = vector.broadcast %cst_20 : f32 to vector<16x32xf32>
      %28 = arith.maximumf %26, %27 : vector<16x32xf32>
      %c0_21 = arith.constant 0 : index
      %c0_22 = arith.constant 0 : index
      %29 = vector.load %arg7[%c0_21, %c0_22] : memref<16x32xf32, #tpu.memory_space<vmem>>, vector<16x32xf32>
      tpu.vector_store %arg7[%c0_21, %c0_22], %28 {strides = array<i32>} : memref<16x32xf32, #tpu.memory_space<vmem>>, vector<16x32xf32>,
    } else {
    }
    return
  }
  func.func @transform_0(%arg0: i32, %arg1: i32) -> (i32, i32) {
    %c0_i32 = arith.constant 0 : i32
    return %arg0, %arg1 : i32, i32
  }
  func.func @transform_1(%arg0: i32, %arg1: i32) -> (i32, i32) {
    %c0_i32 = arith.constant 0 : i32
    %c0_i32_0 = arith.constant 0 : i32
    return %arg1, %c0_i32 : i32, i32
  }
  func.func @transform_2(%arg0: i32, %arg1: i32) -> (i32, i32) {
    %c0_i32 = arith.constant 0 : i32
    %c0_i32_0 = arith.constant 0 : i32
    return %arg0, %c0_i32 : i32, i32
  }
  func.func @transform_3(%arg0: i32, %arg1: i32) -> (i32, i32) {
    %c0_i32 = arith.constant 0 : i32
    %c0_i32_0 = arith.constant 0 : i32
    return %arg0, %c0_i32 : i32, i32
  }
  func.func @transform_4(%arg0: i32, %arg1: i32) -> (i32, i32) {
    %c0_i32 = arith.constant 0 : i32
    %c0_i32_0 = arith.constant 0 : i32
    %c0_i32_1 = arith.constant 0 : i32
    return %c0_i32, %c0_i32_0 : i32, i32
  }
  func.func @transform_5(%arg0: i32, %arg1: i32) -> (i32, i32) {
    %c0_i32 = arith.constant 0 : i32
    %c0_i32_0 = arith.constant 0 : i32
    return %arg0, %c0_i32 : i32, i32
  }
}

</mosaic_0001>

<bundles_post_ra>
// kernel: tpu_custom_call.1
= control target key start
LH: loop header
LB: loop body
LE: loop exit
PB: predicated region body
PF: predicated region fallthrough
CT: control target
= control target key end

     0   :  { %10 = vsyncpa [#allocation4], 0  ;;  %s771_s0 = inlined_call_operand.hbm [shape: bf16[16,16], index: 0, kind: input, shape index: {}]   ;;  %s772_s1 = inlined_call_operand.hbm [shape: f32[16,9], index: 1, kind: input, shape index: {}]   ;;  %s773_s2 = inlined_call_operand.hbm [shape: f32[16,9], index: 2, kind: input, shape index: {}]   ;;  %s774_s3 = inlined_call_operand.hbm [shape: f32[16,1], index: 3, kind: input, shape index: {}]   ;;  %s775_s4 = inlined_call_operand.hbm [shape: f32[40,32], index: 4, kind: input, shape index: {}]   ;;  %s776_s5 = inlined_call_operand.hbm [shape: f32[16,32], index: 5, kind: output, shape index: {}]  }
   0x1   :  { %11 = vsyncpa [#allocation7], 0 }
   0x2   :  { %12 = vsyncpa [#allocation10], 0 }
   0x3   :  { %13 = vsyncpa [#allocation5], 0  ;;  %s633_s18 = smov [#allocation6]   ;;  %s493_s22 = scalar_lea.hbm %s772_s1, 256 }
   0x4   :  { %s31_s19 = sshll.u32 %s633_s18, 4  ;;  %p494_p0 = scmp.ne.s32.totalorder %s772_s1, %s493_s22  ;;  %s32_s19 = int_to_ptr.vmem [resolvable:$true] %s31_s19 }
   0x5   :  { %p497_p1 = scmp.lt.u32.totalorder %s493_s22, %s772_s1 }
   0x7   :  { %p499_p2 = pnand %p497_p1, %p494_p0 }
   0x9   :  { %502 = shalt.err (!%p499_p2)
}
   0xa   :  { %s503_s27 = scalar_lea.vmem %s32_s19, 256  ;;  %p508_p4 = scmp.lt.s32.totalorder %s32_s19, %s32_s19 }
   0xb   :  { %p504_p3 = scmp.ne.s32.totalorder %s32_s19, %s503_s27  ;;  %p509_p5 = scmp.lt.s32.totalorder %s503_s27, %s503_s27 }
   0xd   :  { %p510_p6 = por %p509_p5, %p508_p4 }
   0xf   :  { %p511_p7 = pnand %p510_p6, %p504_p3 }
  0x11   :  { %514 = shalt.err (!%p511_p7)
}
  0x12   :  { %s634_s28 = smov 128   ;;  %s635_s29 = smov 8  }
  0x13   :  { %37 = dma.hbm_to_vmem [thread:$0]  %s772_s1, 256, %s32_s19, [#allocation7], %s634_s28, %s634_s28, %s635_s29  }
  0x14   :  { %s636_s7 = smov [#allocation9]   ;;  %s637_s9 = smov [#allocation3]  }
  0x15   :  { %s55_s8 = sshll.u32 %s636_s7, 4  ;;  %s19_s10 = sshll.u32 %s637_s9, 4  ;;  %s56_s8 = int_to_ptr.vmem [resolvable:$true] %s55_s8  ;;  %s20_s10 = int_to_ptr.vmem [resolvable:$true] %s19_s10 }
  0x16   :  { %s515_s13 = scalar_lea.hbm %s774_s3, 256 }
  0x17   :  { %p516_p8 = scmp.ne.s32.totalorder %s774_s3, %s515_s13  ;;  %p519_p9 = scmp.lt.u32.totalorder %s515_s13, %s774_s3 }
  0x19   :  { %p521_p10 = pnand %p519_p9, %p516_p8 }
  0x1b   :  { %524 = shalt.err (!%p521_p10)
}
  0x1c   :  { %s525_s1 = scalar_lea.vmem %s56_s8, 256  ;;  %p530_p12 = scmp.lt.s32.totalorder %s56_s8, %s56_s8 }
  0x1d   :  { %p526_p11 = scmp.ne.s32.totalorder %s56_s8, %s525_s1  ;;  %p531_p13 = scmp.lt.s32.totalorder %s525_s1, %s525_s1 }
  0x1f   :  { %p532_p0 = por %p531_p13, %p530_p12 }
  0x21   :  { %p533_p1 = pnand %p532_p0, %p526_p11 }
  0x23   :  { %536 = shalt.err (!%p533_p1)
}
  0x24   :  { %61 = dma.hbm_to_vmem [thread:$0]  %s774_s3, 256, %s56_s8, [#allocation10], %s634_s28, %s634_s28, %s635_s29  }
  0x25   :  { %s537_s22 = scalar_lea.hbm %s771_s0, 128 }
  0x26   :  { %p538_p2 = scmp.ne.s32.totalorder %s771_s0, %s537_s22  ;;  %p541_p3 = scmp.lt.u32.totalorder %s537_s22, %s771_s0 }
  0x28   :  { %p543_p4 = pnand %p541_p3, %p538_p2 }
  0x2a   :  { %546 = shalt.err (!%p543_p4)
}
  0x2b   :  { %s547_s27 = scalar_lea.vmem %s20_s10, 128  ;;  %p552_p6 = scmp.lt.s32.totalorder %s20_s10, %s20_s10 }
  0x2c   :  { %p548_p5 = scmp.ne.s32.totalorder %s20_s10, %s547_s27  ;;  %p553_p7 = scmp.lt.s32.totalorder %s547_s27, %s547_s27 }
  0x2e   :  { %p554_p8 = por %p553_p7, %p552_p6 }
  0x30   :  { %p555_p9 = pnand %p554_p8, %p548_p5 }
  0x32   :  { %558 = shalt.err (!%p555_p9)
}
  0x33   :  { %s638_s3 = smov 64   ;;  %s639_s30 = smov 4  }
  0x34   :  { %25 = dma.hbm_to_vmem [thread:$0]  %s771_s0, 128, %s20_s10, [#allocation4], %s638_s3, %s638_s3, %s639_s30  }
  0x35   :  { %s640_s8 = smov [#allocation8]   ;;  %s641_s11 = smov [#allocation11]  }
  0x36   :  { %s43_s9 = sshll.u32 %s640_s8, 4  ;;  %s67_s12 = sshll.u32 %s641_s11, 4  ;;  %s44_s9 = int_to_ptr.vmem [resolvable:$true] %s43_s9  ;;  %s68_s12 = int_to_ptr.vmem [resolvable:$true] %s67_s12 }
  0x37   :  { %s559_s15 = scalar_lea.hbm %s773_s2, 256 }
  0x38   :  { %p560_p10 = scmp.ne.s32.totalorder %s773_s2, %s559_s15  ;;  %p563_p11 = scmp.lt.u32.totalorder %s559_s15, %s773_s2 }
  0x3a   :  { %p565_p12 = pnand %p563_p11, %p560_p10 }
  0x3c   :  { %568 = shalt.err (!%p565_p12)
}
  0x3d   :  { %s569_s0 = scalar_lea.vmem %s44_s9, 256  ;;  %p574_p0 = scmp.lt.s32.totalorder %s44_s9, %s44_s9 }
  0x3e   :  { %p570_p13 = scmp.ne.s32.totalorder %s44_s9, %s569_s0  ;;  %p575_p1 = scmp.lt.s32.totalorder %s569_s0, %s569_s0 }
  0x40   :  { %p576_p2 = por %p575_p1, %p574_p0 }
  0x42   :  { %p577_p3 = pnand %p576_p2, %p570_p13 }
  0x44   :  { %580 = shalt.err (!%p577_p3)
}
  0x45   :  { %49 = dma.hbm_to_vmem [thread:$0]  %s773_s2, 256, %s44_s9, [#allocation7], %s634_s28, %s634_s28, %s635_s29  }
  0x46   :  { %s581_s22 = scalar_lea.hbm %s775_s4, 640 }
  0x47   :  { %p582_p4 = scmp.ne.s32.totalorder %s775_s4, %s581_s22  ;;  %p585_p5 = scmp.lt.u32.totalorder %s581_s22, %s775_s4 }
  0x49   :  { %p587_p6 = pnand %p585_p5, %p582_p4 }
  0x4b   :  { %590 = shalt.err (!%p587_p6)
}
  0x4c   :  { %s591_s27 = scalar_lea.vmem %s68_s12, 640  ;;  %p596_p8 = scmp.lt.s32.totalorder %s68_s12, %s68_s12 }
  0x4d   :  { %p592_p7 = scmp.ne.s32.totalorder %s68_s12, %s591_s27  ;;  %p597_p9 = scmp.lt.s32.totalorder %s591_s27, %s591_s27 }
  0x4f   :  { %p598_p10 = por %p597_p9, %p596_p8 }
  0x51   :  { %p599_p11 = pnand %p598_p10, %p592_p7 }
  0x53   :  { %602 = shalt.err (!%p599_p11)
}
  0x54   :  { %73 = dma.hbm_to_vmem [thread:$0]  %s775_s4, 640, %s68_s12, [#allocation10], %s634_s28, %s634_s28, %s635_s29  }
  0x55   :  { %625 = dma.done.wait [#allocation4], 128  }
  0x56   :  { %626 = vsyncadd [#allocation4], 4294967168 }
  0x57   :  { %627 = dma.done.wait [#allocation7], 512  }
  0x58   :  { %628 = vsyncadd [#allocation7], 4294966784 }
  0x59   :  { %629 = dma.done.wait [#allocation10], 896  }
  0x5a   :  { %630 = vsyncadd [#allocation10], 4294966400  ;;  %vm93_vm0 = vcmask 72704   ;;  %v642_v0 = vmov 0   ;;  %v643_v1 = vmov 0.0   ;;  %v102_v2 = vld [vmem:[#allocation6] sm:$0xff]  ;;  %v386_v30 = vlaneseq }
  0x5b   :  { %492 = vset.pattern.permute.xlu0 %v642_v0  ;;  %95 = vst.msk [vmem:[#allocation2 + $0x8] sm:$0xff] %vm93_vm0, %v643_v1  ;;  %94 = vst.msk [vmem:[#allocation2] sm:$0xff] %vm93_vm0, %v643_v1  ;;  %v103_v3 = vld [vmem:[#allocation6 + $0x8] sm:$0xff]  ;;  %v425_v4 = vld [vmem:[#allocation3] sm:$0xff]   ;;  %vm104_vm1 = vcmask 130048   ;;  %vm223_vm2 = vcmask 1040384  }
  0x5c   :  { %v461_v5 = vpack.c.bf16 %v103_v3, %v102_v2  ;;  %v426_v6 = vunpack.c.l.bf16 %v425_v4  ;;  %v201_v7 = vld [vmem:[#allocation9] sm:$0xff]  ;;  %v427_v8 = vunpack.c.h.bf16 %v425_v4  ;;  %v202_v9 = vld [vmem:[#allocation9 + $0x8] sm:$0xff]  ;;  %vm644_vm3 = vmmov 1   ;;  %v215_v13 = vld [vmem:[#allocation8] sm:$0xff]  ;;  %s645_s4 = smov [#allocation12]  }
  0x5d   :  { %205 = vperm.xlu0 %492, %v201_v7   ;;  %v196_v10 = vld [vmem:[#allocation11 + $0x10] sm:$0xff]  ;;  %v197_v11 = vld [vmem:[#allocation11 + $0x18] sm:$0xff]  ;;  %vm466_vm4 = vmpackc.low %vm223_vm2, %vm644_vm3  ;;  %451 = vmatprep.mubr.msk.f32.mxu1 %vm93_vm0, %v215_v13  ;;  %v387_v31 = vshrl.u32 %v386_v30, 7  ;;  %s402_s30 = sshll.u32 %s645_s4, 4  ;;  %vm394_vm5 = vcmask 261120   ;;  %s403_s30 = int_to_ptr.vmem [resolvable:$true] %s402_s30 }
  0x5e   :  { %462 = vmatprep.subr.bf16.mxu0 %v461_v5  ;;  %444 = vmatprep.mubr.msk.f32.mxu0 %vm104_vm1, %v426_v6  ;;  %v465_v12 = vpack.c.bf16 %v197_v11, %v196_v10  ;;  %v216_v14 = vld [vmem:[#allocation8 + $0x8] sm:$0xff]  ;;  %v194_v15 = vld [vmem:[#allocation11] sm:$0xff]  ;;  %s603_s6 = scalar_lea.vmem %s403_s30, 256  ;;  %p608_p13 = scmp.lt.s32.totalorder %s403_s30, %s403_s30 }
  0x5f   :  { %464 = vmatpush3.bf16.msra.mxu0 %v461_v5  ;;  %v195_v16 = vld [vmem:[#allocation11 + $0x8] sm:$0xff]  ;;  %v388_v32 = vsub.s32 0, %v387_v31  ;;  %v198_v33 = vld [vmem:[#allocation11 + $0x20] sm:$0xff]  ;;  %p604_p12 = scmp.ne.s32.totalorder %s403_s30, %s603_s6  ;;  %p609_p0 = scmp.lt.s32.totalorder %s603_s6, %s603_s6 }
  0x60   :  { %467 = vmatprep.subr.msk.bf16.mxu1 %vm466_vm4, %v465_v12  ;;  %v471_v17 = vpack.c.bf16 %v195_v16, %v194_v15 }
  0x61   :  { %210 = vperm.xlu0 %492, %v202_v9   ;;  %470 = vmatpush3.bf16.msk.msra.mxu1 %vm466_vm4, %v465_v12  ;;  %v389_v34 = vrot.slane %v198_v33, %v388_v32  ;;  %p610_p1 = por %p609_p0, %p608_p13 }
  0x62   :  { %445 = vmatmul.mubr.msk.f32.vlgmr.msra.gmra.mrb[0].mxu0 %vm104_vm1, %v427_v8  ;;  %473 = vmatprep.subr.msk.bf16.mxu1 %vm466_vm4, %v471_v17  ;;  %v101_v18 = vld [vmem:[#allocation2 + $0x8] sm:$0xff]  ;;  %v100_v19 = vld [vmem:[#allocation2] sm:$0xff] }
  0x63   :  { %p611_p2 = pnand %p610_p1, %p604_p12 }
  0x64   :  { %452 = vmatmul.mubr.msk.f32.vlgmr.msra.gmra.mrb[0].mxu1 %vm93_vm0, %v216_v14 }
  0x65   :  { %476 = vmatpush3.bf16.msk.msra.mxu1 %vm466_vm4, %v471_v17 }
  0xdc   :  { %v206_v24 = vpop.permute.xlu0 %205 }
  0xe0   :  { %v211_v28 = vpop.permute.xlu0 %210 }
 0x135   :  { %v446_v20 = vpop.f32.mrb[0].mxu0 }
 0x136   :  { %v187_v21 = vadd.f32 %v446_v20, %v101_v18  ;;  %v177_v22 = vpop.f32.mrb[1].mxu0 }
 0x137   :  { %v186_v23 = vadd.f32 %v177_v22, %v100_v19 }
 0x138   :  { %190 = vst.msk [vmem:[#allocation2 + $0x8] sm:$0xff] %vm93_vm0, %v187_v21 }
 0x139   :  { %189 = vst.msk [vmem:[#allocation2] sm:$0xff] %vm93_vm0, %v186_v23 }
 0x13f   :  { %v200_v25 = vld [vmem:[#allocation2 + $0x8] sm:$0xff] }
 0x140   :  { %v199_v26 = vld [vmem:[#allocation2] sm:$0xff]  ;;  %v214_v29 = vmul.f32 %v211_v28, %v200_v25 }
 0x141   :  { %v213_v27 = vmul.f32 %v206_v24, %v199_v26 }
 0x143   :  { %458 = vmatprep.mubr.msk.f32.mxu1 %vm93_vm0, %v213_v27 }
 0x144   :  { %459 = vmatmul.mubr.msk.f32.vlgmr.msra.gmra.mrb[0].mxu1 %vm93_vm0, %v214_v29 }
 0x217   :  { %v460_v35 = vpop.f32.mrb[0].mxu1 }
 0x218   :  { %v391_v36 = vadd.f32 %v460_v35, %v389_v34  ;;  %v377_v37 = vpop.f32.mrb[1].mxu1 }
 0x219   :  { %v390_v38 = vadd.f32 %v389_v34, %v377_v37 }
 0x21a   :  { %v393_v39 = vmax.f32 %v391_v36, 0.0 }
 0x21b   :  { %v392_v40 = vmax.f32 %v390_v38, 0.0 }
 0x21c   :  { %396 = vst.msk [vmem:[#allocation12 + $0x8] sm:$0xff] %vm394_vm5, %v393_v39 }
 0x21d   :  { %395 = vst.msk [vmem:[#allocation12] sm:$0xff] %vm394_vm5, %v392_v40 }
 0x21e   :  { %614 = shalt.err (!%p611_p2)
}
 0x21f   :  { %s615_s9 = scalar_lea.hbm %s776_s5, 256 }
 0x220   :  { %p616_p3 = scmp.ne.s32.totalorder %s776_s5, %s615_s9  ;;  %p619_p4 = scmp.lt.u32.totalorder %s615_s9, %s776_s5 }
 0x222   :  { %p621_p5 = pnand %p619_p4, %p616_p3 }
 0x224   :  { %624 = shalt.err (!%p621_p5)
}
 0x225   :  { %408 = dma.vmem_to_hbm [thread:$0]  %s403_s30, 256, %s776_s5, [#allocation5], %s634_s28, %s634_s28, %s635_s29  }
 0x226   :  { %631 = dma.done.wait [#allocation5], 256  }
 0x227   :  { %632 = vsyncadd [#allocation5], 4294967040 }
 0x228   :  { %412 = vsyncpa [#allocation4], 1 }
 0x229   :  { %413 = vsyncpa [#allocation7], 1 }
 0x22a   :  { %414 = vsyncpa [#allocation10], 1 }
 0x22b   :  { %415 = vsyncpa [#allocation5], 1 }

</bundles_post_ra>
